<compile_context>
chip_gen: v7x
topology: tpu7x:2x2x1
jax: 0.10.0
libtpu: 0.0.40
codegen_flags: <defaults>
</compile_context>

<pallas_src>
import functools

import jax
import jax.numpy as jnp
from jax import lax
from jax.experimental import pallas as pl
from jax.experimental.pallas import tpu as pltpu

# ~1M elements (~4 MiB f32) per input block: amortises the ~0.35us per-step
# overhead on v6e/v7x while 2 inputs x 2 pipeline buffers + small accumulators
# stay well inside scoped VMEM on every generation.
_TARGET_BLOCK_ELEMS = 1 << 20


def _make_kernel(N, HW, tb_n, tile_hw, sub, need_n_mask, need_hw_mask):
    fold = tb_n > sub  # fold sublane-tile groups into the small accumulator

    def _accumulate(pred_ref, gt_ref, acc_sum, acc_cnt, nb, hb, apply_tail_masks):
        p = pred_ref[...].astype(jnp.float32)
        g = gt_ref[...].astype(jnp.float32)
        valid = g > 0.0  # strict gt > 0, matching torch; False on NaN garbage
        if apply_tail_masks:
            if need_hw_mask:
                lane = lax.broadcasted_iota(jnp.int32, p.shape, 1)
                valid = jnp.logical_and(valid, hb * tile_hw + lane < HW)
            if need_n_mask:
                row = lax.broadcasted_iota(jnp.int32, p.shape, 0)
                valid = jnp.logical_and(valid, nb * tb_n + row < N)
        # select (not multiply) so NaN/Inf in un-DMA'd tail regions never propagate
        err = jnp.where(valid, jnp.abs(p - g), 0.0)
        cnt = jnp.where(valid, 1.0, 0.0)
        if fold:
            groups = tb_n // sub
            err = functools.reduce(
                jnp.add, [err[i * sub:(i + 1) * sub, :] for i in range(groups)])
            cnt = functools.reduce(
                jnp.add, [cnt[i * sub:(i + 1) * sub, :] for i in range(groups)])
        acc_sum[...] += err
        acc_cnt[...] += cnt

    def kernel(pred_ref, gt_ref, psum_ref, pcnt_ref, acc_sum, acc_cnt):
        nb = pl.program_id(0)
        hb = pl.program_id(1)
        last_hb = pl.num_programs(1) - 1

        @pl.when(hb == 0)
        def _():
            acc_sum[...] = jnp.zeros_like(acc_sum)
            acc_cnt[...] = jnp.zeros_like(acc_cnt)

        if not (need_n_mask or need_hw_mask):
            _accumulate(pred_ref, gt_ref, acc_sum, acc_cnt, nb, hb, False)
        else:
            tail = None
            if need_hw_mask:
                tail = hb == last_hb
            if need_n_mask:
                n_tail = nb == pl.num_programs(0) - 1
                tail = n_tail if tail is None else jnp.logical_or(tail, n_tail)

            @pl.when(jnp.logical_not(tail))
            def _():
                _accumulate(pred_ref, gt_ref, acc_sum, acc_cnt, nb, hb, False)

            @pl.when(tail)
            def _():
                _accumulate(pred_ref, gt_ref, acc_sum, acc_cnt, nb, hb, True)

        # Per-batch-block partial results, written once at the last HW step of
        # this nb (lets the nb axis be "parallel" across TensorCores).
        @pl.when(hb == last_hb)
        def _():
            psum_ref[...] = jnp.broadcast_to(jnp.sum(acc_sum[...]), psum_ref.shape)
            pcnt_ref[...] = jnp.broadcast_to(jnp.sum(acc_cnt[...]), pcnt_ref.shape)

    return kernel


def mae_loss(prediction, gt, input=None, epoch=0):
    """Pallas equivalent of MAE_loss.forward(prediction, gt, input, epoch)."""
    del input, epoch  # unused by the reference forward pass
    N, C, H, W = prediction.shape
    assert gt.shape == (N, 1, H, W), gt.shape
    HW = H * W

    # Free, contiguous, lane-dense views; channel 0 of prediction occupies the
    # first HW elements of each row of pred2d.
    pred2d = prediction.reshape(N, C * HW)
    gt2d = gt.reshape(N, HW)

    # --- tile selection ------------------------------------------------------
    min_itemsize = min(prediction.dtype.itemsize, gt.dtype.itemsize)
    row_align = 8 * max(1, 4 // int(min_itemsize))  # 8 (f32) / 16 (bf16) / 32 (i8)

    if N <= row_align:
        tb_n = N                                    # full batch dim (always legal)
    else:
        tb_n = min((N // row_align) * row_align, max(32, row_align))

    lane_budget = max(128, (_TARGET_BLOCK_ELEMS // tb_n) // 128 * 128)
    hw_padded = ((HW + 127) // 128) * 128
    tile_hw = min(lane_budget, hw_padded)           # multiple of 128

    grid_n = pl.cdiv(N, tb_n)
    grid_hw = pl.cdiv(HW, tile_hw)
    need_n_mask = (N % tb_n) != 0
    need_hw_mask = (HW % tile_hw) != 0
    sub = 8 if (tb_n > 8 and tb_n % 8 == 0) else tb_n   # accumulator sublanes

    kernel = _make_kernel(N, HW, tb_n, tile_hw, sub, need_n_mask, need_hw_mask)

    # Explicit scoped-VMEM budget: 2 inputs x 2 pipeline buffers + accumulators
    # + headroom, clamped to a value valid on v5e/v6e/v7x.
    in_block_bytes = tb_n * tile_hw * (prediction.dtype.itemsize + gt.dtype.itemsize)
    acc_bytes = 2 * sub * tile_hw * 4
    vmem_limit = int(min(max(2 * in_block_bytes + acc_bytes + (8 << 20), 16 << 20),
                         48 << 20))

    blk = (tb_n, tile_hw)
    psum, pcnt = pl.pallas_call(
        kernel,
        out_shape=(
            jax.ShapeDtypeStruct((grid_n, 8, 128), jnp.float32),
            jax.ShapeDtypeStruct((grid_n, 8, 128), jnp.float32),
        ),
        grid_spec=pltpu.PrefetchScalarGridSpec(
            num_scalar_prefetch=0,
            grid=(grid_n, grid_hw),
            in_specs=[
                # Lane-block index hb stays within [0, HW) of each row, so only
                # channel 0 of prediction is ever DMA'd from HBM.
                pl.BlockSpec(blk, lambda nb, hb: (nb, hb)),
                pl.BlockSpec(blk, lambda nb, hb: (nb, hb)),
            ],
            out_specs=(
                pl.BlockSpec((1, 8, 128), lambda nb, hb: (nb, 0, 0)),
                pl.BlockSpec((1, 8, 128), lambda nb, hb: (nb, 0, 0)),
            ),
            scratch_shapes=[
                pltpu.VMEM((sub, tile_hw), jnp.float32),  # masked |err| partials
                pltpu.VMEM((sub, tile_hw), jnp.float32),  # masked count partials
            ],
        ),
        compiler_params=pltpu.CompilerParams(
            dimension_semantics=("parallel", "arbitrary"),
            vmem_limit_bytes=vmem_limit,
        ),
    )(pred2d, gt2d)

    total_sum = jnp.sum(psum[:, 0, 0])
    total_cnt = jnp.sum(pcnt[:, 0, 0])
    # mean over masked elements (NaN if the mask is empty, matching torch)
    return total_sum / total_cnt


if __name__ == "__main__":
    key = jax.random.PRNGKey(0)
    k1, k2 = jax.random.split(key)

    N, C, H, W = 2, 4, 16, 16
    prediction = jax.random.normal(k1, (N, C, H, W), dtype=jnp.float32)
    # gt: mix of positive and non-positive values so the mask is non-trivial
    gt = jax.random.normal(k2, (N, 1, H, W), dtype=jnp.float32)

    out = jax.block_until_ready(mae_loss(prediction, gt))

    # pure-JAX reference
    pred0 = prediction[:, 0:1]
    abs_err = jnp.abs(pred0 - gt)
    mask = gt > 0
    ref = jnp.sum(jnp.where(mask, abs_err, 0.0)) / jnp.sum(mask.astype(jnp.float32))

    assert jnp.allclose(out, ref, rtol=1e-5, atol=1e-6), (out, ref)
    print("KERNEL_OK")
</pallas_src>

<mosaic_0001>
module attributes {stable_mosaic.version = 11 : i64} {
  func.func @kernel(%arg0: i32, %arg1: i32, %arg2: memref<2x256xf32, #tpu.memory_space<vmem>>, %arg3: memref<2x256xf32, #tpu.memory_space<vmem>>, %arg4: memref<1x8x128xf32, #tpu.memory_space<vmem>>, %arg5: memref<1x8x128xf32, #tpu.memory_space<vmem>>, %arg6: memref<2x256xf32, #tpu.memory_space<vmem>>, %arg7: memref<2x256xf32, #tpu.memory_space<vmem>>) attributes {dimension_semantics = [#tpu.dimension_semantics<parallel>, #tpu.dimension_semantics<arbitrary>], iteration_bounds = array<i64: 1, 1>, scalar_prefetch = 0 : i64, scratch_operands = 2 : i64, tpu.core_type = #tpu.core_type<tc>, window_params = [{transform_indices = @transform_0, window_bounds = array<i64: 2, 256>}, {transform_indices = @transform_1, window_bounds = array<i64: 2, 256>}, {transform_indices = @transform_2, window_bounds = array<i64: 1, 8, 128>}, {transform_indices = @transform_3, window_bounds = array<i64: 1, 8, 128>}]} {
    %c0_i32 = arith.constant 0 : i32
    %0 = arith.cmpi eq, %arg1, %c0_i32 : i32
    %1 = arith.extui %0 : i1 to i32
    %c0_i32_0 = arith.constant 0 : i32
    %2 = arith.cmpi ne, %1, %c0_i32_0 : i32
    scf.if %2 {
      %cst_17 = arith.constant 0.000000e+00 : f32
      %23 = vector.broadcast %cst_17 : f32 to vector<2x256xf32>
      %c0_18 = arith.constant 0 : index
      %c0_19 = arith.constant 0 : index
      %24 = vector.load %arg6[%c0_18, %c0_19] : memref<2x256xf32, #tpu.memory_space<vmem>>, vector<2x256xf32>
      tpu.vector_store %arg6[%c0_18, %c0_19], %23 {strides = array<i32>} : memref<2x256xf32, #tpu.memory_space<vmem>>, vector<2x256xf32>,
      %cst_20 = arith.constant 0.000000e+00 : f32
      %25 = vector.broadcast %cst_20 : f32 to vector<2x256xf32>
      %c0_21 = arith.constant 0 : index
      %c0_22 = arith.constant 0 : index
      %26 = vector.load %arg7[%c0_21, %c0_22] : memref<2x256xf32, #tpu.memory_space<vmem>>, vector<2x256xf32>
      tpu.vector_store %arg7[%c0_21, %c0_22], %25 {strides = array<i32>} : memref<2x256xf32, #tpu.memory_space<vmem>>, vector<2x256xf32>,
    } else {
    }
    %c0 = arith.constant 0 : index
    %c0_1 = arith.constant 0 : index
    %3 = vector.load %arg2[%c0, %c0_1] : memref<2x256xf32, #tpu.memory_space<vmem>>, vector<2x256xf32>
    %c0_2 = arith.constant 0 : index
    %c0_3 = arith.constant 0 : index
    %4 = vector.load %arg3[%c0_2, %c0_3] : memref<2x256xf32, #tpu.memory_space<vmem>>, vector<2x256xf32>
    %cst = arith.constant 0.000000e+00 : f32
    %5 = vector.broadcast %cst : f32 to vector<2x256xf32>
    %6 = arith.cmpf ogt, %4, %5 : vector<2x256xf32>
    %7 = arith.subf %3, %4 : vector<2x256xf32>
    %8 = math.absf %7 : vector<2x256xf32>
    %cst_4 = arith.constant 0.000000e+00 : f32
    %9 = vector.broadcast %cst_4 : f32 to vector<2x256xf32>
    %10 = arith.select %6, %8, %9 : vector<2x256xi1>, vector<2x256xf32>
    %cst_5 = arith.constant 1.000000e+00 : f32
    %cst_6 = arith.constant 0.000000e+00 : f32
    %11 = vector.broadcast %cst_5 : f32 to vector<2x256xf32>
    %12 = vector.broadcast %cst_6 : f32 to vector<2x256xf32>
    %13 = arith.select %6, %11, %12 : vector<2x256xi1>, vector<2x256xf32>
    %c0_7 = arith.constant 0 : index
    %c0_8 = arith.constant 0 : index
    %14 = vector.load %arg6[%c0_7, %c0_8] : memref<2x256xf32, #tpu.memory_space<vmem>>, vector<2x256xf32>
    %15 = arith.addf %14, %10 : vector<2x256xf32>
    %c0_9 = arith.constant 0 : index
    %c0_10 = arith.constant 0 : index
    %16 = vector.load %arg6[%c0_9, %c0_10] : memref<2x256xf32, #tpu.memory_space<vmem>>, vector<2x256xf32>
    tpu.vector_store %arg6[%c0_9, %c0_10], %15 {strides = array<i32>} : memref<2x256xf32, #tpu.memory_space<vmem>>, vector<2x256xf32>,
    %c0_11 = arith.constant 0 : index
    %c0_12 = arith.constant 0 : index
    %17 = vector.load %arg7[%c0_11, %c0_12] : memref<2x256xf32, #tpu.memory_space<vmem>>, vector<2x256xf32>
    %18 = arith.addf %17, %13 : vector<2x256xf32>
    %c0_13 = arith.constant 0 : index
    %c0_14 = arith.constant 0 : index
    %19 = vector.load %arg7[%c0_13, %c0_14] : memref<2x256xf32, #tpu.memory_space<vmem>>, vector<2x256xf32>
    tpu.vector_store %arg7[%c0_13, %c0_14], %18 {strides = array<i32>} : memref<2x256xf32, #tpu.memory_space<vmem>>, vector<2x256xf32>,
    %c0_i32_15 = arith.constant 0 : i32
    %20 = arith.cmpi eq, %arg1, %c0_i32_15 : i32
    %21 = arith.extui %20 : i1 to i32
    %c0_i32_16 = arith.constant 0 : i32
    %22 = arith.cmpi ne, %21, %c0_i32_16 : i32
    scf.if %22 {
      %c0_17 = arith.constant 0 : index
      %c0_18 = arith.constant 0 : index
      %23 = vector.load %arg6[%c0_17, %c0_18] : memref<2x256xf32, #tpu.memory_space<vmem>>, vector<2x256xf32>
      %24 = vector.shape_cast %23 : vector<2x256xf32> to vector<1x2x256xf32>
      %cst_19 = arith.constant dense<0.000000e+00> : vector<1xf32>
      %25 = vector.multi_reduction <add>, %24, %cst_19 [1, 2] : vector<1x2x256xf32> to vector<1xf32>
      %26 = vector.shape_cast %25 : vector<1xf32> to vector<1x1x1xf32>
      %27 = vector.extract %26[0, 0, 0] : f32 from vector<1x1x1xf32>
      %28 = vector.broadcast %27 : f32 to vector<1x8x128xf32>
      %c0_20 = arith.constant 0 : index
      %c0_21 = arith.constant 0 : index
      %c0_22 = arith.constant 0 : index
      %29 = vector.load %arg4[%c0_20, %c0_21, %c0_22] : memref<1x8x128xf32, #tpu.memory_space<vmem>>, vector<1x8x128xf32>
      tpu.vector_store %arg4[%c0_20, %c0_21, %c0_22], %28 {strides = array<i32>} : memref<1x8x128xf32, #tpu.memory_space<vmem>>, vector<1x8x128xf32>,
      %c0_23 = arith.constant 0 : index
      %c0_24 = arith.constant 0 : index
      %30 = vector.load %arg7[%c0_23, %c0_24] : memref<2x256xf32, #tpu.memory_space<vmem>>, vector<2x256xf32>
      %31 = vector.shape_cast %30 : vector<2x256xf32> to vector<1x2x256xf32>
      %cst_25 = arith.constant dense<0.000000e+00> : vector<1xf32>
      %32 = vector.multi_reduction <add>, %31, %cst_25 [1, 2] : vector<1x2x256xf32> to vector<1xf32>
      %33 = vector.shape_cast %32 : vector<1xf32> to vector<1x1x1xf32>
      %34 = vector.extract %33[0, 0, 0] : f32 from vector<1x1x1xf32>
      %35 = vector.broadcast %34 : f32 to vector<1x8x128xf32>
      %c0_26 = arith.constant 0 : index
      %c0_27 = arith.constant 0 : index
      %c0_28 = arith.constant 0 : index
      %36 = vector.load %arg5[%c0_26, %c0_27, %c0_28] : memref<1x8x128xf32, #tpu.memory_space<vmem>>, vector<1x8x128xf32>
      tpu.vector_store %arg5[%c0_26, %c0_27, %c0_28], %35 {strides = array<i32>} : memref<1x8x128xf32, #tpu.memory_space<vmem>>, vector<1x8x128xf32>,
    } else {
    }
    return
  }
  func.func @transform_0(%arg0: i32, %arg1: i32) -> (i32, i32) {
    %c0_i32 = arith.constant 0 : i32
    return %arg0, %arg1 : i32, i32
  }
  func.func @transform_1(%arg0: i32, %arg1: i32) -> (i32, i32) {
    %c0_i32 = arith.constant 0 : i32
    return %arg0, %arg1 : i32, i32
  }
  func.func @transform_2(%arg0: i32, %arg1: i32) -> (i32, i32, i32) {
    %c0_i32 = arith.constant 0 : i32
    %c0_i32_0 = arith.constant 0 : i32
    %c0_i32_1 = arith.constant 0 : i32
    return %arg0, %c0_i32, %c0_i32_0 : i32, i32, i32
  }
  func.func @transform_3(%arg0: i32, %arg1: i32) -> (i32, i32, i32) {
    %c0_i32 = arith.constant 0 : i32
    %c0_i32_0 = arith.constant 0 : i32
    %c0_i32_1 = arith.constant 0 : i32
    return %arg0, %c0_i32, %c0_i32_0 : i32, i32, i32
  }
}

</mosaic_0001>

<bundles_post_ra>
// kernel: tpu_custom_call.1
= control target key start
LH: loop header
LB: loop body
LE: loop exit
PB: predicated region body
PF: predicated region fallthrough
CT: control target
= control target key end

     0   :  { %9 = vsyncpa [#allocation5], 0  ;;  %s334_s0 = inlined_call_operand.hbm [shape: f32[2,1024], index: 0, kind: input, shape index: {}]   ;;  %s335_s1 = inlined_call_operand.hbm [shape: f32[2,256], index: 1, kind: input, shape index: {}]   ;;  %s336_s2 = inlined_call_operand.hbm [shape: f32[1,8,128], index: 2, kind: output, shape index: {0}]   ;;  %s337_s3 = inlined_call_operand.hbm [shape: f32[1,8,128], index: 3, kind: output, shape index: {1}]  }
   0x1   :  { %10 = vsyncpa [#allocation8], 0 }
   0x2   :  { %11 = vsyncpa [#allocation6], 0 }
   0x3   :  { %12 = vsyncpa [#allocation11], 0  ;;  %s251_s12 = smov [#allocation4]   ;;  %s252_s14 = smov [#allocation7]  }
   0x4   :  { %s19_s13 = sshll.u32 %s251_s12, 4  ;;  %s29_s15 = sshll.u32 %s252_s14, 4  ;;  %s20_s13 = int_to_ptr.vmem [resolvable:$true] %s19_s13  ;;  %s276_s15 = int_to_ptr.vmem [resolvable:$true] %s29_s15 }
   0x5   :  { %s155_s18 = scalar_lea.hbm %s334_s0, 64  ;;  %s157_s23 = scalar_lea.hbm %s334_s0, 256 }
   0x6   :  { %p156_p0 = scmp.ne.s32.totalorder %s334_s0, %s155_s18  ;;  %p158_p1 = scmp.lt.u32.totalorder %s157_s23, %s155_s18 }
   0x7   :  { %p159_p2 = scmp.lt.u32.totalorder %s155_s18, %s334_s0 }
   0x9   :  { %p160_p3 = por %p159_p2, %p158_p1 }
   0xb   :  { %p161_p4 = pnand %p160_p3, %p156_p0 }
   0xd   :  { %164 = shalt.err (!%p161_p4)
}
   0xe   :  { %s165_s26 = scalar_lea.vmem %s20_s13, 64  ;;  %p170_p6 = scmp.lt.s32.totalorder %s20_s13, %s20_s13 }
   0xf   :  { %p166_p5 = scmp.ne.s32.totalorder %s20_s13, %s165_s26  ;;  %p171_p7 = scmp.lt.s32.totalorder %s165_s26, %s165_s26 }
  0x11   :  { %p172_p8 = por %p171_p7, %p170_p6 }
  0x13   :  { %p173_p9 = pnand %p172_p8, %p166_p5 }
  0x15   :  { %176 = shalt.err (!%p173_p9)
}
  0x16   :  { %22 = dma.hbm_to_vmem [thread:$0]  %s334_s0, 64, %s20_s13, [#allocation5]  }
  0x17   :  { %s177_s4 = scalar_lea.hbm %s335_s1, 64 }
  0x18   :  { %p178_p10 = scmp.ne.s32.totalorder %s335_s1, %s177_s4  ;;  %p181_p11 = scmp.lt.u32.totalorder %s177_s4, %s335_s1 }
  0x1a   :  { %p183_p12 = pnand %p181_p11, %p178_p10 }
  0x1c   :  { %186 = shalt.err (!%p183_p12)
}
  0x1d   :  { %s187_s9 = scalar_lea.vmem %s276_s15, 64  ;;  %p192_p0 = scmp.lt.s32.totalorder %s276_s15, %s276_s15 }
  0x1e   :  { %p188_p13 = scmp.ne.s32.totalorder %s276_s15, %s187_s9  ;;  %p193_p1 = scmp.lt.s32.totalorder %s187_s9, %s187_s9 }
  0x20   :  { %p194_p2 = por %p193_p1, %p192_p0 }
  0x22   :  { %p195_p3 = pnand %p194_p2, %p188_p13 }
  0x24   :  { %198 = shalt.err (!%p195_p3)
}
  0x25   :  { %32 = dma.hbm_to_vmem [thread:$0]  %s335_s1, 64, %s276_s15, [#allocation8]  }
  0x26   :  { %243 = dma.done.wait [#allocation5], 64  }
  0x27   :  { %244 = vsyncadd [#allocation5], 4294967232 }
  0x28   :  { %245 = dma.done.wait [#allocation8], 64  }
  0x29   :  { %246 = vsyncadd [#allocation8], 4294967232  ;;  %v253_v0 = vmov 0.0   ;;  %v45_v1 = vld [vmem:[#allocation4] sm:$0xf]  ;;  %vm73_vm1 = vcmask 1041408  }
  0x2a   :  { %43 = vst [vmem:[#allocation2] sm:$0xf] %v253_v0  ;;  %44 = vst [vmem:[#allocation3] sm:$0xf] %v253_v0  ;;  %v46_v2 = vld [vmem:[#allocation7] sm:$0xf] }
  0x2b   :  { %vm47_vm0 = vcmp.gt.f32.partialorder %v46_v2, 0.0  ;;  %v48_v3 = vsub.f32 %v45_v1, %v46_v2  ;;  %s254_s1 = smov [#allocation9]   ;;  %s255_s13 = smov [#allocation10]  }
  0x2c   :  { %v51_v5 = vsel %vm47_vm0, 1.0, %v253_v0  ;;  %s120_s11 = sshll.u32 %s254_s1, 4  ;;  %s130_s14 = sshll.u32 %s255_s13, 4  ;;  %s121_s11 = int_to_ptr.vmem [resolvable:$true] %s120_s11  ;;  %s131_s14 = int_to_ptr.vmem [resolvable:$true] %s130_s14 }
  0x2d   :  { %v49_v6 = vand.u32 2147483647, %v48_v3  ;;  %s199_s15 = scalar_lea.vmem %s121_s11, 128  ;;  %p204_p5 = scmp.lt.s32.totalorder %s121_s11, %s121_s11 }
  0x2e   :  { %p200_p4 = scmp.ne.s32.totalorder %s121_s11, %s199_s15  ;;  %p205_p6 = scmp.lt.s32.totalorder %s199_s15, %s199_s15 }
  0x2f   :  { %v50_v9 = vsel %vm47_vm0, %v49_v6, 0.0 }
  0x30   :  { %p206_p7 = por %p205_p6, %p204_p5 }
  0x31   :  { %v55_v4 = vld [vmem:[#allocation3] sm:$0xf]  ;;  %v52_v7 = vld [vmem:[#allocation2] sm:$0xf] }
  0x32   :  { %v56_v8 = vadd.f32 %v55_v4, %v51_v5  ;;  %v53_v10 = vadd.f32 %v52_v7, %v50_v9  ;;  %p207_p8 = pnand %p206_p7, %p200_p4 }
  0x34   :  { %57 = vst [vmem:[#allocation3] sm:$0xf] %v56_v8  ;;  %54 = vst [vmem:[#allocation2] sm:$0xf] %v53_v10 }
  0x3b   :  { %v145_v11 = vld.sshfl [vmem:[#allocation3] sm:$0x33 pattern:$0x76325410] }
  0x3c   :  { %v97_v12 = vcombine.high %v145_v11, %v145_v11  ;;  %v144_v13 = vld.sshfl [vmem:[#allocation2] sm:$0x33 pattern:$0x76325410]  ;;  %v100_v17 = vsel %vm73_vm1, %v145_v11, 0.0 }
  0x3d   :  { %v70_v14 = vcombine.high %v144_v13, %v144_v13  ;;  %v74_v15 = vsel %vm73_vm1, %v144_v13, 0.0 }
  0x3e   :  { %v101_v18 = vsel %vm73_vm1, %v97_v12, 0.0 }
  0x3f   :  { %v75_v16 = vsel %vm73_vm1, %v70_v14, 0.0  ;;  %v102_v20 = vadd.f32 %v101_v18, %v100_v17 }
  0x40   :  { %v76_v19 = vadd.f32 %v75_v16, %v74_v15 }
  0x42   :  { %77 = vadd.xlane.f32.xlu0 %v76_v19 }
  0x46   :  { %103 = vadd.xlane.f32.xlu0 %v102_v20 }
  0xcf   :  { %v78_v21 = vpop.xlane.xlu0 %77 }
  0xd0   :  { %v79_v22 = vrot.slane %v78_v21, 4 }
  0xd2   :  { %v80_v23 = vadd.f32 %v79_v22, %v78_v21 }
  0xd3   :  { %v104_v24 = vpop.xlane.xlu0 %103 }
  0xd4   :  { %v81_v25 = vrot.slane %v80_v23, 2  ;;  %v105_v26 = vrot.slane %v104_v24, 4 }
  0xd6   :  { %v106_v27 = vadd.f32 %v105_v26, %v104_v24  ;;  %v82_v28 = vadd.f32 %v81_v25, %v80_v23 }
  0xd8   :  { %v107_v29 = vrot.slane %v106_v27, 2  ;;  %v83_v30 = vrot.slane %v82_v28, 1 }
  0xda   :  { %v108_v31 = vadd.f32 %v107_v29, %v106_v27  ;;  %v84_v32 = vadd.f32 %v83_v30, %v82_v28 }
  0xdc   :  { %146 = vpush %v84_v32  ;;  %v109_v33 = vrot.slane %v108_v31, 1 }
  0xde   :  { %v110_v34 = vadd.f32 %v109_v33, %v108_v31 }
  0xe0   :  { %148 = vpush %v110_v34 }
 0x10d   :  { %s147_s12 = spop %146 }
 0x10e   :  { %v86_v35 = vstv %s147_s12 }
 0x10f   :  { %87 = vst [vmem:[#allocation9] sm:$0xff] %v86_v35 }
 0x110   :  { %210 = shalt.err (!%p207_p8)
}
 0x111   :  { %s211_s18 = scalar_lea.hbm %s336_s2, 128 }
 0x112   :  { %p212_p9 = scmp.ne.s32.totalorder %s336_s2, %s211_s18  ;;  %p215_p10 = scmp.lt.u32.totalorder %s211_s18, %s336_s2 }
 0x114   :  { %p217_p11 = pnand %p215_p10, %p212_p9 }
 0x116   :  { %220 = shalt.err (!%p217_p11)
}
 0x117   :  { %123 = dma.vmem_to_hbm [thread:$0]  %s121_s11, 128, %s336_s2, [#allocation6]  }
 0x118   :  { %s149_s25 = spop %148  ;;  %s221_s26 = scalar_lea.vmem %s131_s14, 128 }
 0x119   :  { %v112_v36 = vstv %s149_s25  ;;  %p222_p12 = scmp.ne.s32.totalorder %s131_s14, %s221_s26  ;;  %p226_p13 = scmp.lt.s32.totalorder %s131_s14, %s131_s14 }
 0x11a   :  { %113 = vst [vmem:[#allocation10] sm:$0xff] %v112_v36  ;;  %p227_p0 = scmp.lt.s32.totalorder %s221_s26, %s221_s26 }
 0x11c   :  { %p228_p1 = por %p227_p0, %p226_p13 }
 0x11e   :  { %p229_p2 = pnand %p228_p1, %p222_p12 }
 0x120   :  { %232 = shalt.err (!%p229_p2)
}
 0x121   :  { %s233_s29 = scalar_lea.hbm %s337_s3, 128 }
 0x122   :  { %p234_p3 = scmp.ne.s32.totalorder %s337_s3, %s233_s29  ;;  %p237_p4 = scmp.lt.u32.totalorder %s233_s29, %s337_s3 }
 0x124   :  { %p239_p5 = pnand %p237_p4, %p234_p3 }
 0x126   :  { %242 = shalt.err (!%p239_p5)
}
 0x127   :  { %133 = dma.vmem_to_hbm [thread:$0]  %s131_s14, 128, %s337_s3, [#allocation11]  }
 0x128   :  { %247 = dma.done.wait [#allocation6], 128  }
 0x129   :  { %248 = vsyncadd [#allocation6], 4294967168 }
 0x12a   :  { %249 = dma.done.wait [#allocation11], 128  }
 0x12b   :  { %250 = vsyncadd [#allocation11], 4294967168 }
 0x12c   :  { %140 = vsyncpa [#allocation5], 1 }
 0x12d   :  { %141 = vsyncpa [#allocation8], 1 }
 0x12e   :  { %142 = vsyncpa [#allocation6], 1 }
 0x12f   :  { %143 = vsyncpa [#allocation11], 1 }

</bundles_post_ra>
